<compile_context>
chip_gen: v6e
topology: v6e:2x2x1
jax: 0.10.0
libtpu: 0.0.40
codegen_flags: <defaults>
</compile_context>

<pallas_src>
import jax
import jax.numpy as jnp
from jax.experimental import pallas as pl
from jax.experimental.pallas import tpu as pltpu


def _lambda_copy_kernel(x_hbm_ref, o_hbm_ref, sem):
    # Materialized Lambda(flatten): values are identical, so the whole
    # "compute" is one DMA-engine HBM->HBM copy.  No VMEM staging, no
    # per-grid-step overhead, no vector load/store slots.
    copy = pltpu.make_async_copy(x_hbm_ref, o_hbm_ref, sem)
    copy.start()
    copy.wait()


def lambda_flatten(x, *, materialize=False):
    """Forward of Lambda(lambda x: x.view(x.size(0), -1)) for NCHW x."""
    B = x.shape[0]
    F = 1
    for d in x.shape[1:]:
        F *= d

    # PyTorch's .view is metadata-only; the fastest "kernel" is no kernel.
    flat = x.reshape(B, F)
    if not materialize:
        return flat

    # Contractually-required fresh buffer: single HBM->HBM DMA.  Both refs
    # stay in place (pl.ANY), the DMA engine moves the bytes, and the kernel
    # body never touches VMEM or the vector units.
    total_bytes = B * F * x.dtype.itemsize
    return pl.pallas_call(
        _lambda_copy_kernel,
        out_shape=jax.ShapeDtypeStruct((B, F), x.dtype),
        in_specs=[pl.BlockSpec(memory_space=pl.ANY)],
        out_specs=pl.BlockSpec(memory_space=pl.ANY),
        scratch_shapes=[pltpu.SemaphoreType.DMA],
        cost_estimate=pl.CostEstimate(
            flops=0, transcendentals=0, bytes_accessed=2 * total_bytes),
    )(flat)


if __name__ == "__main__":
    key = jax.random.PRNGKey(0)

    # Small NCHW conv-style input, as fed to the flatten Lambda.
    B, C, H, W = 2, 4, 16, 16
    x = jax.random.normal(key, (B, C, H, W), dtype=jnp.float32)
    ref = x.reshape(B, C * H * W)

    # Recommended path: metadata-only flatten (no kernel, no HBM traffic).
    out_view = jax.block_until_ready(lambda_flatten(x))
    assert out_view.shape == (B, C * H * W)
    assert out_view.dtype == x.dtype
    assert jnp.array_equal(out_view, ref)

    # Materialized path: run the HBM->HBM DMA kernel once and block on it.
    out_mat = jax.block_until_ready(lambda_flatten(x, materialize=True))
    assert out_mat.shape == (B, C * H * W)
    assert out_mat.dtype == x.dtype
    assert jnp.array_equal(out_mat, ref)

    # Ragged feature dim (not a multiple of 128): the DMA copy has no
    # lane-alignment requirement, so no special fallback path is needed.
    x2 = jax.random.normal(jax.random.PRNGKey(1), (2, 3, 5, 7), dtype=jnp.float32)
    out2 = jax.block_until_ready(lambda_flatten(x2, materialize=True))
    assert jnp.array_equal(out2, x2.reshape(2, 3 * 5 * 7))

    print("KERNEL_OK")
</pallas_src>

<mosaic_0001>
module attributes {stable_mosaic.version = 11 : i64} {
  func.func @_lambda_copy_kernel(%arg0: memref<2x1024xf32, #tpu.memory_space<any>>, %arg1: memref<2x1024xf32, #tpu.memory_space<any>>, %arg2: memref<!tpu.dma_semaphore, #tpu.memory_space<semaphore_mem>>) attributes {dimension_semantics = [], scalar_prefetch = 0 : i64, scratch_operands = 1 : i64, tpu.core_type = #tpu.core_type<tc>} {
    tpu.enqueue_dma source(%arg0 : memref<2x1024xf32, #tpu.memory_space<any>>) target(%arg1 : memref<2x1024xf32, #tpu.memory_space<any>>) target_semaphore(%arg2 : memref<!tpu.dma_semaphore, #tpu.memory_space<semaphore_mem>>)
    tpu.wait_dma2 semaphore(%arg2 : memref<!tpu.dma_semaphore, #tpu.memory_space<semaphore_mem>>) src(%arg0 : memref<2x1024xf32, #tpu.memory_space<any>>) dst(%arg1 : memref<2x1024xf32, #tpu.memory_space<any>>)
    return
  }
}

</mosaic_0001>

<bundles_post_ra>
// kernel: tpu_custom_call.1
= control target key start
LH: loop header
LB: loop body
LE: loop exit
PB: predicated region body
PF: predicated region fallthrough
CT: control target
= control target key end

     0   :  { %s29_s6 = smov [#allocation2]   ;;  %s30_s7 = smov 131072   ;;  %s48_s0 = inlined_call_operand.hbm [shape: f32[2,1024], index: 0, kind: input, shape index: {}]   ;;  %s49_s1 = inlined_call_operand.hbm [shape: f32[2,1024], index: 1, kind: output, shape index: {}]  }
   0x1   :  { %s31_s8 = smov 0  }
   0x2   :  { %12 = dma.general %s48_s0, 256, %s49_s1, %s29_s6, %s30_s7, [#allocation4], %s31_s8, 0  }
   0x3   :  { %27 = dma.done.wait [#allocation2], 256 }
   0x4   :  { %28 = vsyncadd [#allocation2], 4294967040 }
   0x5   :  { %17 = vsyncmov [#allocation2] }
   0x8   :  { %s18_s13 = vpop.sfrf %17 }
   0x9   :  { %p23_p0 = scmp.ne.s32.totalorder %s18_s13, 0 }
   0xb   :  { %22 = shalt.err (%p23_p0)  }

</bundles_post_ra>
